<compile_context>
chip_gen: v5e
topology: v5e:2x2
jax: 0.10.0
libtpu: 0.0.40
codegen_flags: <defaults>
</compile_context>

<pallas_src>
import functools

import jax
import jax.numpy as jnp
from jax.experimental import pallas as pl
from jax.experimental.pallas import tpu as pltpu

IGNORE_INDEX = -100  # torch.nn.functional.nll_loss default (used by the reference)


def _ce_kernel(tgt_ref, logits_ref, loss_ref, m_sc, l_sc, t_sc):
    """Online (flash-style) log-sum-exp cross entropy over vocab blocks.

    Per grid step (i = row block, k = vocab block):
      tgt_ref    : (TM, 1)   int32    resident across the vocab axis
      logits_ref : (TM, TKV)          one vocab block
      loss_ref   : (1,1,TM)  float32  lane-dense per-token loss (written last k)
      m_sc/l_sc/t_sc : (TM, 1) f32    running max / sum(exp) / target logit
    """
    k = pl.program_id(1)
    tkv = logits_ref.shape[-1]

    @pl.when(k == 0)
    def _init():
        m_sc[...] = jnp.full(m_sc.shape, -jnp.inf, dtype=m_sc.dtype)
        l_sc[...] = jnp.zeros(l_sc.shape, dtype=l_sc.dtype)
        t_sc[...] = jnp.zeros(t_sc.shape, dtype=t_sc.dtype)

    logits = logits_ref[...].astype(jnp.float32)             # (TM, TKV)
    tgt = tgt_ref[...]                                        # (TM, 1) int32

    # Online LSE update (numerically stable).
    m_prev = m_sc[...]
    m_new = jnp.maximum(m_prev, jnp.max(logits, axis=-1, keepdims=True))
    alpha = jnp.exp(m_prev - m_new)                           # 0 on first block
    p = jnp.exp(logits - m_new)                               # EUP
    l_sc[...] = alpha * l_sc[...] + jnp.sum(p, axis=-1, keepdims=True)
    m_sc[...] = m_new

    # Gather the target logit for columns that fall in this vocab block.
    col = jax.lax.broadcasted_iota(jnp.int32, logits.shape, 1) + k * tkv
    t_sc[...] += jnp.sum(jnp.where(col == tgt, logits, 0.0),
                         axis=-1, keepdims=True)

    @pl.when(k == pl.num_programs(1) - 1)
    def _finalize():
        loss = m_sc[...] + jnp.log(l_sc[...]) - t_sc[...]     # -log_softmax[target]
        loss = jnp.where(tgt == IGNORE_INDEX, 0.0, loss)
        # (TM, 1) -> (1, TM): one small XLU transpose so the store is lane-dense
        # (unmasked vst instead of per-step vst.msk partial stores).
        loss_ref[...] = jnp.transpose(loss, (1, 0)).reshape(loss_ref.shape)


def _pick_vocab_tile(vocab, max_lanes=2048):
    """Largest multiple-of-128 divisor of `vocab` <= max_lanes (or full vocab)."""
    if vocab <= max_lanes:
        return vocab
    for t in range(max_lanes, 127, -128):
        if vocab % t == 0:
            return t
    return vocab  # fallback: whole vocab per block


def _pick_row_tile(n_rows, tkv, sublane_align):
    """Row tile from a ~2 MiB (f32-equivalent) per-step budget.

    Big enough to amortize the ~0.35us/step pipeline overhead, small enough
    that the double-buffered inputs plus f32 temporaries stay well inside
    VMEM on every generation (v7x only has 64 MiB per TensorCore).
    """
    cap = max(sublane_align, (2 << 20) // (tkv * 4))
    if n_rows <= cap:
        return n_rows
    t = (cap // sublane_align) * sublane_align
    while t >= sublane_align:
        if n_rows % t == 0:
            return t
        t -= sublane_align
    return n_rows  # pathological n_rows: fall back to a single block


def _cross_entropy_rows(logits2d, target2d):
    """Per-row cross entropy for logits2d (N, V), target2d (N, 1) int32 -> (N,) f32."""
    n_rows, vocab = logits2d.shape
    itemsize = jnp.dtype(logits2d.dtype).itemsize
    sublane_align = {4: 8, 2: 16, 1: 32}.get(itemsize, 8)    # match sublane packing
    tkv = _pick_vocab_tile(vocab)
    tm = _pick_row_tile(n_rows, tkv, sublane_align)

    in_block = tm * tkv * itemsize
    f32_block = tm * tkv * 4
    vmem_limit = int(min(max(2 * in_block + 8 * f32_block + (2 << 20), 16 << 20),
                         56 << 20))

    out = pl.pallas_call(
        _ce_kernel,
        out_shape=jax.ShapeDtypeStruct((n_rows // tm, 1, tm), jnp.float32),
        grid_spec=pltpu.PrefetchScalarGridSpec(
            num_scalar_prefetch=0,
            grid=(n_rows // tm, vocab // tkv),
            in_specs=[
                # TODO(synk): targets could also go through scalar prefetch/SMEM;
                # the (TM, 1) VMEM block is tiny and stays resident across k.
                pl.BlockSpec((tm, 1), lambda i, k: (i, 0)),
                pl.BlockSpec((tm, tkv), lambda i, k: (i, k)),
            ],
            out_specs=pl.BlockSpec((1, 1, tm), lambda i, k: (i, 0, 0)),
            scratch_shapes=[
                pltpu.VMEM((tm, 1), jnp.float32),   # running max
                pltpu.VMEM((tm, 1), jnp.float32),   # running sum(exp)
                pltpu.VMEM((tm, 1), jnp.float32),   # target logit
            ],
        ),
        compiler_params=pltpu.CompilerParams(
            dimension_semantics=("parallel", "arbitrary"),
            vmem_limit_bytes=vmem_limit),
    )(target2d, logits2d)
    return out.reshape(n_rows)


@functools.partial(jax.jit, static_argnames=("reduction",))
def vocab_sequence_parallel_cross_entropy(logits, target, reduction="mean",
                                          label_smoothing=0.0):
    """logits: (bsz, seq, vocab); target: (bsz, seq). Single device (sp_size == 1)."""
    # TODO(synk): label_smoothing is accepted but never applied, exactly like the
    # reference forward (it threads the argument through without using it).
    del label_smoothing
    bsz, seq, vocab = logits.shape
    assert target.shape == (bsz, seq)
    n_rows = bsz * seq

    # Free reshape (no HBM copy) -- rows are processed in natural (bsz, seq)
    # order, which is exactly the order of the reference's final output.
    logits2d = logits.reshape(n_rows, vocab)
    target2d = target.reshape(n_rows, 1).astype(jnp.int32)

    loss_flat = _cross_entropy_rows(logits2d, target2d)       # float32, (bsz*seq,)

    if reduction == "mean":
        # matches: torch.sum(loss_all.float()) / loss_all.numel()
        return jnp.sum(loss_flat) / loss_flat.size
    # reference returns loss_all (logits dtype) flattened in (bsz, seq) order
    return loss_flat.astype(logits.dtype)


class VocabSequenceParallelCrossEntropyLoss:
    """JAX/Pallas port of the PyTorch module (forward only, sp_size == 1)."""

    def __init__(self, ignore_index=-100, reduction="mean",
                 label_smoothing=0.0, process_group=None):
        if reduction not in ("mean", "none"):
            raise NotImplementedError("Only support reduction = 'mean' or 'none'")
        # Note: the reference forward always uses nll_loss's default ignore_index
        # (-100) regardless of this attribute; we mirror that behaviour.
        self.ignore_index = ignore_index
        self.reduction = reduction
        self.label_smoothing = label_smoothing
        self.process_group = process_group  # unused: single device

    def __call__(self, _input, target):
        return vocab_sequence_parallel_cross_entropy(
            _input, target, reduction=self.reduction,
            label_smoothing=self.label_smoothing)


if __name__ == "__main__":
    key = jax.random.PRNGKey(0)
    k_logits, k_tgt = jax.random.split(key)

    def reference(logits, target, reduction):
        logp = jax.nn.log_softmax(logits.astype(jnp.float32), axis=-1)
        safe_t = jnp.where(target == IGNORE_INDEX, 0, target)
        tok = -jnp.take_along_axis(logp, safe_t[..., None], axis=-1)[..., 0]
        tok = jnp.where(target == IGNORE_INDEX, 0.0, tok)
        if reduction == "mean":
            return jnp.sum(tok) / tok.size
        return tok.reshape(-1)

    # Small primary example (also exercises ignore_index).
    bsz, seq, vocab = 2, 8, 512
    logits = jax.random.normal(k_logits, (bsz, seq, vocab), dtype=jnp.float32)
    target = jax.random.randint(k_tgt, (bsz, seq), 0, vocab, dtype=jnp.int32)
    target = target.at[0, 3].set(IGNORE_INDEX)

    loss_mean = VocabSequenceParallelCrossEntropyLoss(reduction="mean")(logits, target)
    jax.block_until_ready(loss_mean)
    assert jnp.allclose(loss_mean, reference(logits, target, "mean"),
                        rtol=1e-5, atol=1e-5), (loss_mean,
                                                reference(logits, target, "mean"))

    loss_none = VocabSequenceParallelCrossEntropyLoss(reduction="none")(logits, target)
    jax.block_until_ready(loss_none)
    assert loss_none.shape == (bsz * seq,)
    assert jnp.allclose(loss_none, reference(logits, target, "none"),
                        rtol=1e-5, atol=1e-5)

    # Exercise the vocab-blocked online-LSE path (V > vocab tile) and multiple
    # row blocks (N > row tile), still modest sizes.
    bsz2, seq2, vocab2 = 2, 256, 4096
    logits2 = jax.random.normal(k_logits, (bsz2, seq2, vocab2), dtype=jnp.float32)
    target2 = jax.random.randint(k_tgt, (bsz2, seq2), 0, vocab2, dtype=jnp.int32)
    loss2 = VocabSequenceParallelCrossEntropyLoss(reduction="none")(logits2, target2)
    jax.block_until_ready(loss2)
    assert jnp.allclose(loss2, reference(logits2, target2, "none"),
                        rtol=1e-5, atol=1e-4)

    print("KERNEL_OK")
</pallas_src>

<mosaic_0001>
module attributes {stable_mosaic.version = 11 : i64} {
  func.func @_ce_kernel(%arg0: i32, %arg1: i32, %arg2: memref<16x1xi32, #tpu.memory_space<vmem>>, %arg3: memref<16x512xf32, #tpu.memory_space<vmem>>, %arg4: memref<1x1x16xf32, #tpu.memory_space<vmem>>, %arg5: memref<16x1xf32, #tpu.memory_space<vmem>>, %arg6: memref<16x1xf32, #tpu.memory_space<vmem>>, %arg7: memref<16x1xf32, #tpu.memory_space<vmem>>) attributes {dimension_semantics = [#tpu.dimension_semantics<parallel>, #tpu.dimension_semantics<arbitrary>], iteration_bounds = array<i64: 1, 1>, scalar_prefetch = 0 : i64, scratch_operands = 3 : i64, tpu.core_type = #tpu.core_type<tc>, window_params = [{transform_indices = @transform_0, window_bounds = array<i64: 16, 1>}, {transform_indices = @transform_1, window_bounds = array<i64: 16, 512>}, {transform_indices = @transform_2, window_bounds = array<i64: 1, 1, 16>}]} {
    %c0_i32 = arith.constant 0 : i32
    %0 = arith.cmpi eq, %arg1, %c0_i32 : i32
    %1 = arith.extui %0 : i1 to i32
    %c0_i32_0 = arith.constant 0 : i32
    %2 = arith.cmpi ne, %1, %c0_i32_0 : i32
    scf.if %2 {
      %cst_21 = arith.constant 0xFF800000 : f32
      %37 = vector.broadcast %cst_21 : f32 to vector<16x1xf32>
      %c0_22 = arith.constant 0 : index
      %c0_23 = arith.constant 0 : index
      %38 = vector.load %arg5[%c0_22, %c0_23] : memref<16x1xf32, #tpu.memory_space<vmem>>, vector<16x1xf32>
      tpu.vector_store %arg5[%c0_22, %c0_23], %37 {strides = array<i32>} : memref<16x1xf32, #tpu.memory_space<vmem>>, vector<16x1xf32>,
      %cst_24 = arith.constant 0.000000e+00 : f32
      %39 = vector.broadcast %cst_24 : f32 to vector<16x1xf32>
      %c0_25 = arith.constant 0 : index
      %c0_26 = arith.constant 0 : index
      %40 = vector.load %arg6[%c0_25, %c0_26] : memref<16x1xf32, #tpu.memory_space<vmem>>, vector<16x1xf32>
      tpu.vector_store %arg6[%c0_25, %c0_26], %39 {strides = array<i32>} : memref<16x1xf32, #tpu.memory_space<vmem>>, vector<16x1xf32>,
      %cst_27 = arith.constant 0.000000e+00 : f32
      %41 = vector.broadcast %cst_27 : f32 to vector<16x1xf32>
      %c0_28 = arith.constant 0 : index
      %c0_29 = arith.constant 0 : index
      %42 = vector.load %arg7[%c0_28, %c0_29] : memref<16x1xf32, #tpu.memory_space<vmem>>, vector<16x1xf32>
      tpu.vector_store %arg7[%c0_28, %c0_29], %41 {strides = array<i32>} : memref<16x1xf32, #tpu.memory_space<vmem>>, vector<16x1xf32>,
    } else {
    }
    %c0 = arith.constant 0 : index
    %c0_1 = arith.constant 0 : index
    %3 = vector.load %arg3[%c0, %c0_1] : memref<16x512xf32, #tpu.memory_space<vmem>>, vector<16x512xf32>
    %c0_2 = arith.constant 0 : index
    %c0_3 = arith.constant 0 : index
    %4 = vector.load %arg2[%c0_2, %c0_3] : memref<16x1xi32, #tpu.memory_space<vmem>>, vector<16x1xi32>
    %c0_4 = arith.constant 0 : index
    %c0_5 = arith.constant 0 : index
    %5 = vector.load %arg5[%c0_4, %c0_5] : memref<16x1xf32, #tpu.memory_space<vmem>>, vector<16x1xf32>
    %cst = arith.constant dense<0xFF800000> : vector<16xf32>
    %6 = vector.multi_reduction <maximumf>, %3, %cst [1] : vector<16x512xf32> to vector<16xf32>
    %7 = vector.shape_cast %6 : vector<16xf32> to vector<16x1xf32>
    %8 = arith.maximumf %5, %7 : vector<16x1xf32>
    %9 = arith.subf %5, %8 : vector<16x1xf32>
    %10 = math.exp %9 : vector<16x1xf32>
    %11 = vector.broadcast %8 : vector<16x1xf32> to vector<16x512xf32>
    %12 = arith.subf %3, %11 : vector<16x512xf32>
    %13 = math.exp %12 : vector<16x512xf32>
    %c0_6 = arith.constant 0 : index
    %c0_7 = arith.constant 0 : index
    %14 = vector.load %arg6[%c0_6, %c0_7] : memref<16x1xf32, #tpu.memory_space<vmem>>, vector<16x1xf32>
    %15 = arith.mulf %10, %14 : vector<16x1xf32>
    %cst_8 = arith.constant dense<0.000000e+00> : vector<16xf32>
    %16 = vector.multi_reduction <add>, %13, %cst_8 [1] : vector<16x512xf32> to vector<16xf32>
    %17 = vector.shape_cast %16 : vector<16xf32> to vector<16x1xf32>
    %18 = arith.addf %15, %17 : vector<16x1xf32>
    %c0_9 = arith.constant 0 : index
    %c0_10 = arith.constant 0 : index
    %19 = vector.load %arg6[%c0_9, %c0_10] : memref<16x1xf32, #tpu.memory_space<vmem>>, vector<16x1xf32>
    tpu.vector_store %arg6[%c0_9, %c0_10], %18 {strides = array<i32>} : memref<16x1xf32, #tpu.memory_space<vmem>>, vector<16x1xf32>,
    %c0_11 = arith.constant 0 : index
    %c0_12 = arith.constant 0 : index
    %20 = vector.load %arg5[%c0_11, %c0_12] : memref<16x1xf32, #tpu.memory_space<vmem>>, vector<16x1xf32>
    tpu.vector_store %arg5[%c0_11, %c0_12], %8 {strides = array<i32>} : memref<16x1xf32, #tpu.memory_space<vmem>>, vector<16x1xf32>,
    %21 = tpu.iota {dimensions = array<i32: 1>} : vector<16x512xi32>
    %c512_i32 = arith.constant 512 : i32
    %22 = arith.muli %arg1, %c512_i32 : i32
    %23 = vector.broadcast %22 : i32 to vector<16x512xi32>
    %24 = arith.addi %21, %23 : vector<16x512xi32>
    %c0_13 = arith.constant 0 : index
    %c0_14 = arith.constant 0 : index
    %25 = vector.load %arg7[%c0_13, %c0_14] : memref<16x1xf32, #tpu.memory_space<vmem>>, vector<16x1xf32>
    %26 = vector.broadcast %4 : vector<16x1xi32> to vector<16x512xi32>
    %27 = arith.cmpi eq, %24, %26 : vector<16x512xi32>
    %cst_15 = arith.constant 0.000000e+00 : f32
    %28 = vector.broadcast %cst_15 : f32 to vector<16x512xf32>
    %29 = arith.select %27, %3, %28 : vector<16x512xi1>, vector<16x512xf32>
    %cst_16 = arith.constant dense<0.000000e+00> : vector<16xf32>
    %30 = vector.multi_reduction <add>, %29, %cst_16 [1] : vector<16x512xf32> to vector<16xf32>
    %31 = vector.shape_cast %30 : vector<16xf32> to vector<16x1xf32>
    %32 = arith.addf %25, %31 : vector<16x1xf32>
    %c0_17 = arith.constant 0 : index
    %c0_18 = arith.constant 0 : index
    %33 = vector.load %arg7[%c0_17, %c0_18] : memref<16x1xf32, #tpu.memory_space<vmem>>, vector<16x1xf32>
    tpu.vector_store %arg7[%c0_17, %c0_18], %32 {strides = array<i32>} : memref<16x1xf32, #tpu.memory_space<vmem>>, vector<16x1xf32>,
    %c0_i32_19 = arith.constant 0 : i32
    %34 = arith.cmpi eq, %arg1, %c0_i32_19 : i32
    %35 = arith.extui %34 : i1 to i32
    %c0_i32_20 = arith.constant 0 : i32
    %36 = arith.cmpi ne, %35, %c0_i32_20 : i32
    scf.if %36 {
      %c0_21 = arith.constant 0 : index
      %c0_22 = arith.constant 0 : index
      %37 = vector.load %arg5[%c0_21, %c0_22] : memref<16x1xf32, #tpu.memory_space<vmem>>, vector<16x1xf32>
      %c0_23 = arith.constant 0 : index
      %c0_24 = arith.constant 0 : index
      %38 = vector.load %arg6[%c0_23, %c0_24] : memref<16x1xf32, #tpu.memory_space<vmem>>, vector<16x1xf32>
      %39 = math.log %38 : vector<16x1xf32>
      %40 = arith.addf %37, %39 : vector<16x1xf32>
      %c0_25 = arith.constant 0 : index
      %c0_26 = arith.constant 0 : index
      %41 = vector.load %arg7[%c0_25, %c0_26] : memref<16x1xf32, #tpu.memory_space<vmem>>, vector<16x1xf32>
      %42 = arith.subf %40, %41 : vector<16x1xf32>
      %c-100_i32 = arith.constant -100 : i32
      %43 = vector.broadcast %c-100_i32 : i32 to vector<16x1xi32>
      %44 = arith.cmpi eq, %4, %43 : vector<16x1xi32>
      %cst_27 = arith.constant 0.000000e+00 : f32
      %45 = vector.broadcast %cst_27 : f32 to vector<16x1xf32>
      %46 = arith.select %44, %45, %42 : vector<16x1xi1>, vector<16x1xf32>
      %47 = tpu.transpose %46, [1, 0] : vector<16x1xf32> -> vector<1x16xf32>
      %48 = vector.shape_cast %47 : vector<1x16xf32> to vector<1x1x16xf32>
      %c0_28 = arith.constant 0 : index
      %c0_29 = arith.constant 0 : index
      %c0_30 = arith.constant 0 : index
      %49 = vector.load %arg4[%c0_28, %c0_29, %c0_30] : memref<1x1x16xf32, #tpu.memory_space<vmem>>, vector<1x1x16xf32>
      tpu.vector_store %arg4[%c0_28, %c0_29, %c0_30], %48 {strides = array<i32>} : memref<1x1x16xf32, #tpu.memory_space<vmem>>, vector<1x1x16xf32>,
    } else {
    }
    return
  }
  func.func @transform_0(%arg0: i32, %arg1: i32) -> (i32, i32) {
    %c0_i32 = arith.constant 0 : i32
    %c0_i32_0 = arith.constant 0 : i32
    return %arg0, %c0_i32 : i32, i32
  }
  func.func @transform_1(%arg0: i32, %arg1: i32) -> (i32, i32) {
    %c0_i32 = arith.constant 0 : i32
    return %arg0, %arg1 : i32, i32
  }
  func.func @transform_2(%arg0: i32, %arg1: i32) -> (i32, i32, i32) {
    %c0_i32 = arith.constant 0 : i32
    %c0_i32_0 = arith.constant 0 : i32
    %c0_i32_1 = arith.constant 0 : i32
    return %arg0, %c0_i32, %c0_i32_0 : i32, i32, i32
  }
}

</mosaic_0001>

<bundles_post_ra>
// kernel: vocab_sequence_parallel_cross_entropy.1
= control target key start
LH: loop header
LB: loop body
LE: loop exit
PB: predicated region body
PF: predicated region fallthrough
CT: control target
= control target key end

     0   :  { %7 = vsyncpa [#allocation6], 0  ;;  %s291_s12 = smov [#allocation5]   ;;  %s292_s14 = smov 512   ;;  %s411_s0 = inlined_call_operand.vmem [shape: s32[16,1], index: 0, kind: input, shape index: {}]   ;;  %s412_s1 = inlined_call_operand.hbm [shape: f32[16,512], index: 1, kind: input, shape index: {}]   ;;  %s413_s2 = inlined_call_operand.vmem [shape: f32[1,1,16], index: 2, kind: output, shape index: {}]  }
   0x1   :  { %s14_s11 = sshll.u32 %s412_s1, 4  ;;  %s16_s13 = sshll.u32 %s291_s12, 4  ;;  %s15_s11 = int_to_ptr.hbm [resolvable:$true] %s14_s11  ;;  %s17_s13 = int_to_ptr.vmem [resolvable:$true] %s16_s13 }
   0x2   :  { %s293_s15 = smov 32  }
   0x3   :  { %22 = dma.hbm_to_vmem [thread:$0]  %s15_s11, 1024, %s17_s13, [#allocation6], %s292_s14, %s292_s14, %s293_s15  }
   0x4   :  { %289 = dma.done.wait [#allocation6], 1024  }
   0x5   :  { %290 = vsyncadd [#allocation6], 4294966272  ;;  %vm31_vm0 = vcmask 7168   ;;  %v294_v0 = vmov -inf   ;;  %v317_v1 = vld [vmem:[#allocation5] sm:$0xff]  ;;  %v319_v2 = vld [vmem:[#allocation5 + $0x8] sm:$0xff]  ;;  %v123_v27 = vlaneseq }
   0x6   :  { %32 = vst.msk [vmem:[#allocation2] sm:$0xff] %vm31_vm0, %v294_v0  ;;  %v321_v3 = vld [vmem:[#allocation5 + $0x10] sm:$0xff]  ;;  %v323_v4 = vld [vmem:[#allocation5 + $0x18] sm:$0xff]  ;;  %v329_v7 = vld [vmem:[#allocation5 + $0x20] sm:$0xff]  ;;  %v295_v15 = vmov 0   ;;  %v296_v16 = vmov 0.0  }
   0x7   :  { %33 = vst.msk [vmem:[#allocation2 + $0x8] sm:$0xff] %vm31_vm0, %v294_v0  ;;  %v50_v5 = vmax.f32 %v317_v1, %v321_v3  ;;  %v51_v6 = vmax.f32 %v319_v2, %v323_v4  ;;  %v331_v8 = vld [vmem:[#allocation5 + $0x28] sm:$0xff]  ;;  %v333_v9 = vld [vmem:[#allocation5 + $0x30] sm:$0xff]  ;;  %v335_v10 = vld [vmem:[#allocation5 + $0x38] sm:$0xff]  ;;  %238 = vset.pattern.permute.xlu1 %v295_v15  ;;  %239 = vset.pattern.permute.xlu2 %v295_v15  ;;  %v124_v28 = vand.u32 127, %v123_v27  ;;  %vm225_vm11 = vcmask 122880  }
   0x8   :  { %v55_v12 = vmax.f32 %v329_v7, %v333_v9  ;;  %v56_v13 = vmax.f32 %v331_v8, %v335_v10  ;;  %34 = vst.msk [vmem:[#allocation3] sm:$0xff] %vm31_vm0, %v296_v16  ;;  %v350_v17 = vld [vmem:[%s411_s0] sm:$0xff]  ;;  %v356_v18 = vld [vmem:[%s411_s0 + $0x8] sm:$0xff] }
   0x9   :  { %v52_v11 = vmax.f32 %v50_v5, %v51_v6  ;;  %35 = vst.msk [vmem:[#allocation3 + $0x8] sm:$0xff] %vm31_vm0, %v296_v16  ;;  %137 = vperm.xlu2 %239, %v350_v17   ;;  %v125_v29 = vadd.s32 128, %v124_v28  ;;  %v126_v31 = vadd.s32 256, %v124_v28  ;;  %v127_v32 = vadd.s32 384, %v124_v28 }
   0xa   :  { %v57_v14 = vmax.f32 %v55_v12, %v56_v13  ;;  %36 = vst.msk [vmem:[#allocation4] sm:$0xff] %vm31_vm0, %v296_v16  ;;  %vm189_vm9 = vcmp.eq.s32.totalorder %v350_v17, 4294967196  ;;  %vm190_vm10 = vcmp.eq.s32.totalorder %v356_v18, 4294967196 }
   0xb   :  { %53 = vmax.xlane.f32.xlu0 %v52_v11  ;;  %37 = vst.msk [vmem:[#allocation4 + $0x8] sm:$0xff] %vm31_vm0, %v296_v16 }
   0xd   :  { %v359_v19 = vld [vmem:[#allocation2] sm:$0xff] }
   0xe   :  { %v369_v23 = vld [vmem:[#allocation2 + $0x8] sm:$0xff] }
  0x11   :  { %140 = vperm.xlu2 %239, %v356_v18   ;;  %v134_v27 = vld [vmem:[#allocation4] sm:$0xff] }
  0x13   :  { %58 = vmax.xlane.f32.xlu0 %v57_v14 }
  0x63   :  { %v138_v30 = vpop.permute.xlu2 %137 }
  0x64   :  { %vm142_vm1 = vcmp.eq.s32.totalorder %v124_v28, %v138_v30  ;;  %vm143_vm2 = vcmp.eq.s32.totalorder %v125_v29, %v138_v30  ;;  %vm144_vm3 = vcmp.eq.s32.totalorder %v126_v31, %v138_v30  ;;  %vm145_vm4 = vcmp.eq.s32.totalorder %v127_v32, %v138_v30 }
  0x65   :  { %v150_v33 = vsel %vm142_vm1, %v317_v1, 0.0  ;;  %v151_v34 = vsel %vm143_vm2, %v319_v2, 0.0  ;;  %v152_v36 = vsel %vm144_vm3, %v321_v3, 0.0  ;;  %v153_v37 = vsel %vm145_vm4, %v323_v4, 0.0 }
  0x66   :  { %v158_v35 = vadd.f32 %v151_v34, %v150_v33 }
  0x68   :  { %v159_v38 = vadd.f32 %v158_v35, %v152_v36  ;;  %v103_v36 = vld [vmem:[#allocation3 + $0x8] sm:$0xff] }
  0x6a   :  { %v160_v39 = vadd.f32 %v159_v38, %v153_v37  ;;  %v135_v37 = vld [vmem:[#allocation4 + $0x8] sm:$0xff] }
  0x6b   :  { %v141_v48 = vpop.permute.xlu2 %140 }
  0x6c   :  { %161 = vadd.xlane.f32.xlu2 %v160_v39  ;;  %vm146_vm5 = vcmp.eq.s32.totalorder %v124_v28, %v141_v48  ;;  %vm147_vm6 = vcmp.eq.s32.totalorder %v125_v29, %v141_v48  ;;  %vm148_vm7 = vcmp.eq.s32.totalorder %v126_v31, %v141_v48  ;;  %vm149_vm8 = vcmp.eq.s32.totalorder %v127_v32, %v141_v48  ;;  %v102_v31 = vld [vmem:[#allocation3] sm:$0xff] }
  0x6d   :  { %v154_v60 = vsel %vm146_vm5, %v329_v7, 0.0  ;;  %v155_v61 = vsel %vm147_vm6, %v331_v8, 0.0 }
  0x7e   :  { %v54_v20 = vpop.xlane.xlu0 %53 }
  0x7f   :  { %v362_v21 = vmax.f32 %v359_v19, %v54_v20 }
  0x81   :  { %v62_v22 = vsub.f32 %v359_v19, %v362_v21  ;;  %121 = vst.msk [vmem:[#allocation2] sm:$0xff] %vm31_vm0, %v362_v21  ;;  %70 = vperm.xlu1 %238, %v362_v21  }
  0x83   :  { %v64_v29 = vmul.f32 1.442695, %v62_v22 }
  0x86   :  { %v59_v24 = vpop.xlane.xlu0 %58 }
  0x87   :  { %v372_v25 = vmax.f32 %v369_v23, %v59_v24 }
  0x89   :  { %v63_v26 = vsub.f32 %v369_v23, %v372_v25  ;;  %122 = vst.msk [vmem:[#allocation2 + $0x8] sm:$0xff] %vm31_vm0, %v372_v25  ;;  %75 = vperm.xlu1 %238, %v372_v25  }
  0x90   :  { %v176_v48 = vld [vmem:[#allocation2 + $0x8] sm:$0xff] }
  0xdf   :  { %v162_v28 = vpop.xlane.xlu2 %161 }
  0xf3   :  { %v71_v40 = vpop.permute.xlu1 %70 }
  0xf4   :  { %v78_v41 = vsub.f32 %v317_v1, %v71_v40  ;;  %v79_v42 = vsub.f32 %v319_v2, %v71_v40  ;;  %v80_v43 = vsub.f32 %v321_v3, %v71_v40  ;;  %v81_v44 = vsub.f32 %v323_v4, %v71_v40 }
  0xf5   :  { %v163_v2 = vadd.f32 %v155_v61, %v154_v60  ;;  %v156_v4 = vsel %vm148_vm7, %v333_v9, 0.0 }
  0xf6   :  { %v86_v45 = vmul.f32 1.442695, %v78_v41  ;;  %v88_v46 = vmul.f32 1.442695, %v79_v42  ;;  %v90_v47 = vmul.f32 1.442695, %v80_v43 }
  0xf7   :  { %v92_v49 = vmul.f32 1.442695, %v81_v44 }
  0xf8   :  { %241 = vpow2.f32 %v86_v45 }
  0xf9   :  { %243 = vpow2.f32 %v88_v46 }
  0xfa   :  { %245 = vpow2.f32 %v90_v47 }
  0xfb   :  { %v76_v50 = vpop.permute.xlu1 %75  ;;  %247 = vpow2.f32 %v92_v49 }
  0xfc   :  { %v82_v51 = vsub.f32 %v329_v7, %v76_v50  ;;  %v83_v52 = vsub.f32 %v331_v8, %v76_v50  ;;  %v84_v53 = vsub.f32 %v333_v9, %v76_v50  ;;  %v85_v54 = vsub.f32 %v335_v10, %v76_v50 }
  0xfd   :  { %v164_v7 = vadd.f32 %v163_v2, %v156_v4  ;;  %v157_v8 = vsel %vm149_vm8, %v335_v10, 0.0  ;;  %v168_v9 = vadd.f32 %v162_v28, %v134_v27  ;;  %v66_v10 = vmul.f32 1.442695, %v63_v26  ;;  %v175_v26 = vld [vmem:[#allocation2] sm:$0xff] }
  0xfe   :  { %v242_v55 = vpop.eup %241  ;;  %v94_v56 = vmul.f32 1.442695, %v82_v51  ;;  %v96_v57 = vmul.f32 1.442695, %v83_v52  ;;  %v98_v59 = vmul.f32 1.442695, %v84_v53 }
  0xff   :  { %v244_v58 = vpop.eup %243  ;;  %v100_v0 = vmul.f32 1.442695, %v85_v54  ;;  %v165_v14 = vadd.f32 %v164_v7, %v157_v8  ;;  %170 = vst.msk [vmem:[#allocation4] sm:$0xff] %vm31_vm0, %v168_v9 }
 0x100   :  { %249 = vpow2.f32 %v94_v56  ;;  %v106_v62 = vadd.f32 %v244_v58, %v242_v55  ;;  %v246_v63 = vpop.eup %245 }
 0x101   :  { %251 = vpow2.f32 %v96_v57  ;;  %v248_v3 = vpop.eup %247 }
 0x102   :  { %v107_v1 = vadd.f32 %v246_v63, %v106_v62  ;;  %253 = vpow2.f32 %v98_v59 }
 0x103   :  { %255 = vpow2.f32 %v100_v0 }
 0x104   :  { %v108_v5 = vadd.f32 %v248_v3, %v107_v1  ;;  %257 = vpow2.f32 %v64_v29 }
 0x105   :  { %259 = vpow2.f32 %v66_v10 }
 0x106   :  { %v250_v6 = vpop.eup %249  ;;  %109 = vadd.xlane.f32.xlu0 %v108_v5  ;;  %v185_v43 = vld [vmem:[#allocation4] sm:$0xff] }
 0x107   :  { %v252_v11 = vpop.eup %251 }
 0x108   :  { %v111_v12 = vadd.f32 %v252_v11, %v250_v6  ;;  %v254_v13 = vpop.eup %253 }
 0x109   :  { %v256_v20 = vpop.eup %255 }
 0x10a   :  { %v112_v16 = vadd.f32 %v254_v13, %v111_v12  ;;  %v258_v30 = vpop.eup %257 }
 0x10b   :  { %v104_v32 = vmul.f32 %v258_v30, %v102_v31  ;;  %v260_v35 = vpop.eup %259 }
 0x10c   :  { %v113_v24 = vadd.f32 %v256_v20, %v112_v16  ;;  %v105_v38 = vmul.f32 %v260_v35, %v103_v36 }
 0x10e   :  { %166 = vadd.xlane.f32.xlu0 %v165_v14  ;;  %114 = vadd.xlane.f32.xlu1 %v113_v24 }
 0x179   :  { %v110_v33 = vpop.xlane.xlu0 %109 }
 0x17a   :  { %v116_v34 = vadd.f32 %v110_v33, %v104_v32 }
 0x17c   :  { %119 = vst.msk [vmem:[#allocation3] sm:$0xff] %vm31_vm0, %v116_v34 }
 0x181   :  { %v167_v39 = vpop.xlane.xlu0 %166  ;;  %v115_v19 = vpop.xlane.xlu1 %114 }
 0x182   :  { %v169_v21 = vadd.f32 %v167_v39, %v135_v37  ;;  %v117_v22 = vadd.f32 %v115_v19, %v105_v38 }
 0x183   :  { %v177_v40 = vld [vmem:[#allocation3] sm:$0xff] }
 0x184   :  { %171 = vst.msk [vmem:[#allocation4 + $0x8] sm:$0xff] %vm31_vm0, %v169_v21  ;;  %261 = vlog2.f32 %v177_v40 }
 0x185   :  { %120 = vst.msk [vmem:[#allocation3 + $0x8] sm:$0xff] %vm31_vm0, %v117_v22 }
 0x18a   :  { %v262_v23 = vpop.eup %261 }
 0x18b   :  { %v180_v25 = vmul.f32 0.6931472, %v262_v23  ;;  %v186_v50 = vld [vmem:[#allocation4 + $0x8] sm:$0xff] }
 0x18c   :  { %v178_v41 = vld [vmem:[#allocation3 + $0x8] sm:$0xff] }
 0x18d   :  { %v183_v42 = vadd.f32 %v180_v25, %v175_v26  ;;  %263 = vlog2.f32 %v178_v41 }
 0x18f   :  { %v187_v44 = vsub.f32 %v183_v42, %v185_v43 }
 0x191   :  { %v191_v45 = vsel %vm189_vm9, 0.0, %v187_v44 }
 0x192   :  { %193 = vxpose.xlu0.b32.start [1/2] (short) (narrow) %v191_v45, 8 }
 0x193   :  { %v264_v46 = vpop.eup %263 }
 0x194   :  { %v182_v47 = vmul.f32 0.6931472, %v264_v46 }
 0x196   :  { %v184_v49 = vadd.f32 %v182_v47, %v176_v48 }
 0x198   :  { %v188_v51 = vsub.f32 %v184_v49, %v186_v50 }
 0x19a   :  { %v192_v52 = vsel %vm190_vm10, 0.0, %v188_v51 }
 0x19b   :  { %194 = vxpose.xlu0.b32.end [2/2] (short) (narrow) %v192_v52, 8 }
 0x202   :  { %240 = vset.pattern.permute.xlu0 %v295_v15 }
 0x237   :  { %v209_v53 = vpop.trf.xlu0 }
 0x238   :  { %226 = vst.msk [vmem:[%s413_s2] sm:$0x1] %vm225_vm11, %v209_v53 }
 0x239   :  { %231 = vsyncpa [#allocation6], 1 }

</bundles_post_ra>
